<compile_context>
chip_gen: v7x
topology: tpu7x:2x2x1
jax: 0.10.0
libtpu: 0.0.40
codegen_flags: <defaults>
</compile_context>

<pallas_src>
import jax
import jax.numpy as jnp
from jax.experimental import pallas as pl
from jax.experimental.pallas import tpu as pltpu


def _swish_kernel(x_ref, o_ref):
    # f32 opmath regardless of storage dtype (matches PyTorch SiLU/sigmoid
    # opmath for bf16/half); the kernel is HBM-bound so the upcast is free.
    x = x_ref[...].astype(jnp.float32)
    # sigmoid(x) = 0.5 * tanh(0.5 * x) + 0.5 -> a single EUP op per element.
    sig = 0.5 * jnp.tanh(0.5 * x) + 0.5
    o_ref[...] = (x * sig).astype(o_ref.dtype)


def _round_up(a: int, b: int) -> int:
    return ((a + b - 1) // b) * b


def _swish_flat(xf: jax.Array, target_block_bytes: int) -> jax.Array:
    """Swish on a flat array whose length is a multiple of 128."""
    n = xf.shape[0]
    dtype = xf.dtype
    itemsize = jnp.dtype(dtype).itemsize
    # Sublane packing multiple for the storage dtype (8 f32, 16 bf16, 32 s8).
    sub = max(8, 32 // max(itemsize, 1))

    # Widest lane count that divides n exactly -> zero-copy 2D view and fewer,
    # larger DMA descriptors per grid step.
    lanes = 128
    for cand in (1024, 512, 256, 128):
        if n % cand == 0:
            lanes = cand
            break
    rows = n // lanes
    x2d = xf.reshape(rows, lanes)

    # ~target_block_bytes per block, sized off f32 compute width (conservative
    # for sub-4-byte storage dtypes so any f32 intermediates have headroom).
    bpe = max(itemsize, 4)
    tr = max(sub, (target_block_bytes // (lanes * bpe)) // sub * sub)

    nblk = pl.cdiv(rows, tr)
    if rows < 2 * sub:
        # Tiny input: one full-extent block (legal even if rows % sub != 0).
        tr = rows
    elif nblk <= 8:
        # Small grids: use an even number of near-equal blocks so a 2-TC chip
        # (v7x megacore, dimension_semantics="parallel") gets balanced work.
        # On 1-TC chips (v5e/v6e) the extra step costs only ~0.35 us.
        nblk = nblk + (nblk % 2)
        tr = _round_up(pl.cdiv(rows, nblk), sub)
    # Partial last block (rows % tr != 0) is handled by Pallas block masking.
    grid = (pl.cdiv(rows, tr),)

    out2d = pl.pallas_call(
        _swish_kernel,
        out_shape=jax.ShapeDtypeStruct((rows, lanes), dtype),
        grid_spec=pltpu.PrefetchScalarGridSpec(
            num_scalar_prefetch=0,
            grid=grid,
            in_specs=[pl.BlockSpec((tr, lanes), lambda i: (i, 0))],
            out_specs=pl.BlockSpec((tr, lanes), lambda i: (i, 0)),
        ),
        compiler_params=pltpu.CompilerParams(
            dimension_semantics=("parallel",),
            # ~32 MiB of double-buffered blocks; comfortably under v7x's
            # 64 MiB physical VMEM, well under 128 MiB on v5e/v6e.
            vmem_limit_bytes=48 << 20,
        ),
    )(x2d)
    return out2d.reshape(-1)


def swish(x: jax.Array, *, target_block_bytes: int = 8 << 20) -> jax.Array:
    """Elementwise swish (x * sigmoid(x)) via a Pallas TPU kernel."""
    orig_shape = x.shape
    dtype = x.dtype
    if not jnp.issubdtype(dtype, jnp.floating):
        raise TypeError(f"swish expects a floating dtype, got {dtype}")
    n = int(x.size)
    if n == 0:
        return x

    xf = jnp.ravel(x)
    tail = n % 128
    if tail == 0:
        return _swish_flat(xf, target_block_bytes).reshape(orig_shape)

    # Rare ragged path: kernel on the 128-aligned head, tiny (<128 element)
    # tail in plain JAX.  Avoids the pad-concatenate + output-slice HBM passes.
    head_n = n - tail
    tail_x = xf[head_n:].astype(jnp.float32)
    tail_y = (tail_x * (0.5 * jnp.tanh(0.5 * tail_x) + 0.5)).astype(dtype)
    if head_n == 0:
        return tail_y.reshape(orig_shape)
    head_y = _swish_flat(xf[:head_n], target_block_bytes)
    return jnp.concatenate([head_y, tail_y]).reshape(orig_shape)


if __name__ == "__main__":
    key = jax.random.PRNGKey(0)
    k1, k2, k3 = jax.random.split(key, 3)

    def ref_swish(v):
        vf = v.astype(jnp.float32)
        return (jax.nn.sigmoid(vf) * vf).astype(v.dtype)

    # 1) NCHW f32 input matching the PyTorch module's expected usage.
    x = jax.random.normal(k1, (2, 4, 16, 16), dtype=jnp.float32)
    y = swish(x)
    jax.block_until_ready(y)
    assert y.shape == x.shape and y.dtype == x.dtype
    assert jnp.allclose(y, ref_swish(x), atol=1e-5, rtol=1e-5)

    # 2) bf16 input (f32 opmath in-kernel, bf16 blocks in HBM/VMEM).
    xb = jax.random.normal(k2, (2, 4, 16, 16), dtype=jnp.bfloat16)
    yb = swish(xb)
    jax.block_until_ready(yb)
    assert yb.shape == xb.shape and yb.dtype == jnp.bfloat16
    assert jnp.allclose(
        yb.astype(jnp.float32), ref_swish(xb).astype(jnp.float32),
        atol=1e-2, rtol=2e-2,
    )

    # 3) Multi-block (balanced 2-block) grid and ragged n % 128 != 0 tail path.
    xg = jax.random.normal(k3, (64, 8, 128), dtype=jnp.float32)
    yg = swish(xg)
    xr = jax.random.normal(k3, (7, 19), dtype=jnp.float32)  # 133 elements
    yr = swish(xr)
    jax.block_until_ready((yg, yr))
    assert jnp.allclose(yg, ref_swish(xg), atol=1e-5, rtol=1e-5)
    assert yr.shape == xr.shape
    assert jnp.allclose(yr, ref_swish(xr), atol=1e-5, rtol=1e-5)

    print("KERNEL_OK")
</pallas_src>

<mosaic_0001>
module attributes {stable_mosaic.version = 11 : i64} {
  func.func @_swish_kernel(%arg0: i32, %arg1: memref<2x1024xf32, #tpu.memory_space<vmem>>, %arg2: memref<2x1024xf32, #tpu.memory_space<vmem>>) attributes {dimension_semantics = [#tpu.dimension_semantics<parallel>], iteration_bounds = array<i64: 1>, scalar_prefetch = 0 : i64, scratch_operands = 0 : i64, tpu.core_type = #tpu.core_type<tc>, window_params = [{transform_indices = @transform_0, window_bounds = array<i64: 2, 1024>}, {transform_indices = @transform_1, window_bounds = array<i64: 2, 1024>}]} {
    %c0 = arith.constant 0 : index
    %c0_0 = arith.constant 0 : index
    %0 = vector.load %arg1[%c0, %c0_0] : memref<2x1024xf32, #tpu.memory_space<vmem>>, vector<2x1024xf32>
    %cst = arith.constant 5.000000e-01 : f32
    %1 = vector.broadcast %cst : f32 to vector<2x1024xf32>
    %2 = arith.mulf %1, %0 : vector<2x1024xf32>
    %3 = math.tanh %2 : vector<2x1024xf32>
    %cst_1 = arith.constant 5.000000e-01 : f32
    %4 = vector.broadcast %cst_1 : f32 to vector<2x1024xf32>
    %5 = arith.mulf %4, %3 : vector<2x1024xf32>
    %cst_2 = arith.constant 5.000000e-01 : f32
    %6 = vector.broadcast %cst_2 : f32 to vector<2x1024xf32>
    %7 = arith.addf %5, %6 : vector<2x1024xf32>
    %8 = arith.mulf %0, %7 : vector<2x1024xf32>
    %c0_3 = arith.constant 0 : index
    %c0_4 = arith.constant 0 : index
    %9 = vector.load %arg2[%c0_3, %c0_4] : memref<2x1024xf32, #tpu.memory_space<vmem>>, vector<2x1024xf32>
    tpu.vector_store %arg2[%c0_3, %c0_4], %8 {strides = array<i32>} : memref<2x1024xf32, #tpu.memory_space<vmem>>, vector<2x1024xf32>,
    return
  }
  func.func @transform_0(%arg0: i32) -> (i32, i32) {
    %c0_i32 = arith.constant 0 : i32
    %c0_i32_0 = arith.constant 0 : i32
    return %arg0, %c0_i32 : i32, i32
  }
  func.func @transform_1(%arg0: i32) -> (i32, i32) {
    %c0_i32 = arith.constant 0 : i32
    %c0_i32_0 = arith.constant 0 : i32
    return %arg0, %c0_i32 : i32, i32
  }
}

</mosaic_0001>

<bundles_post_ra>
// kernel: tpu_custom_call.1
= control target key start
LH: loop header
LB: loop body
LE: loop exit
PB: predicated region body
PF: predicated region fallthrough
CT: control target
= control target key end

     0   :  { %6 = vsyncpa [#allocation3], 0  ;;  %s140_s0 = inlined_call_operand.hbm [shape: f32[2,1024], index: 0, kind: input, shape index: {}]   ;;  %s141_s1 = inlined_call_operand.hbm [shape: f32[2,1024], index: 1, kind: output, shape index: {}]  }
   0x1   :  { %7 = vsyncpa [#allocation4], 0  ;;  %s104_s6 = smov [#allocation2]   ;;  %s56_s10 = scalar_lea.hbm %s140_s0, 256 }
   0x2   :  { %s14_s7 = sshll.u32 %s104_s6, 4  ;;  %p57_p0 = scmp.ne.s32.totalorder %s140_s0, %s56_s10  ;;  %s15_s7 = int_to_ptr.vmem [resolvable:$true] %s14_s7 }
   0x3   :  { %p60_p1 = scmp.lt.u32.totalorder %s56_s10, %s140_s0 }
   0x5   :  { %p62_p2 = pnand %p60_p1, %p57_p0 }
   0x7   :  { %65 = shalt.err (!%p62_p2)
}
   0x8   :  { %s66_s15 = scalar_lea.vmem %s15_s7, 256  ;;  %p71_p4 = scmp.lt.s32.totalorder %s15_s7, %s15_s7 }
   0x9   :  { %p67_p3 = scmp.ne.s32.totalorder %s15_s7, %s66_s15  ;;  %p72_p5 = scmp.lt.s32.totalorder %s66_s15, %s66_s15 }
   0xb   :  { %p73_p6 = por %p72_p5, %p71_p4 }
   0xd   :  { %p74_p7 = pnand %p73_p6, %p67_p3 }
   0xf   :  { %77 = shalt.err (!%p74_p7)
}
  0x10   :  { %17 = dma.hbm_to_vmem [thread:$0]  %s140_s0, 256, %s15_s7, [#allocation3]  }
  0x11   :  { %100 = dma.done.wait [#allocation3], 256  }
  0x12   :  { %101 = vsyncadd [#allocation3], 4294967040  ;;  %v21_v0 = vld [vmem:[#allocation2] sm:$0xff]  ;;  %v22_v1 = vld [vmem:[#allocation2 + $0x8] sm:$0xff]  ;;  %s105_s18 = smov [#allocation5]  }
  0x13   :  { %v23_v2 = vmul.f32 0.5, %v21_v0  ;;  %v24_v3 = vmul.f32 0.5, %v22_v1  ;;  %s41_s19 = sshll.u32 %s105_s18, 4  ;;  %s42_s19 = int_to_ptr.vmem [resolvable:$true] %s41_s19 }
  0x14   :  { %s78_s0 = scalar_lea.vmem %s42_s19, 256  ;;  %p83_p9 = scmp.lt.s32.totalorder %s42_s19, %s42_s19 }
  0x15   :  { %52 = vtanh.f32 %v23_v2  ;;  %p79_p8 = scmp.ne.s32.totalorder %s42_s19, %s78_s0  ;;  %p84_p10 = scmp.lt.s32.totalorder %s78_s0, %s78_s0 }
  0x16   :  { %54 = vtanh.f32 %v24_v3 }
  0x17   :  { %p85_p11 = por %p84_p10, %p83_p9 }
  0x19   :  { %p86_p12 = pnand %p85_p11, %p79_p8 }
  0x1f   :  { %v53_v4 = vpop.eup %52 }
  0x20   :  { %v55_v5 = vpop.eup %54  ;;  %v27_v6 = vmul.f32 0.5, %v53_v4 }
  0x21   :  { %v28_v7 = vmul.f32 0.5, %v55_v5 }
  0x22   :  { %v29_v8 = vadd.f32 0.5, %v27_v6 }
  0x23   :  { %v30_v9 = vadd.f32 0.5, %v28_v7 }
  0x24   :  { %v31_v10 = vmul.f32 %v29_v8, %v21_v0 }
  0x25   :  { %v32_v11 = vmul.f32 %v30_v9, %v22_v1 }
  0x26   :  { %33 = vst [vmem:[#allocation5] sm:$0xff] %v31_v10 }
  0x27   :  { %34 = vst [vmem:[#allocation5 + $0x8] sm:$0xff] %v32_v11 }
  0x28   :  { %89 = shalt.err (!%p86_p12)
}
  0x29   :  { %s90_s22 = scalar_lea.hbm %s141_s1, 256 }
  0x2a   :  { %p91_p13 = scmp.ne.s32.totalorder %s141_s1, %s90_s22  ;;  %p94_p0 = scmp.lt.u32.totalorder %s90_s22, %s141_s1 }
  0x2c   :  { %p96_p1 = pnand %p94_p0, %p91_p13 }
  0x2e   :  { %99 = shalt.err (!%p96_p1)
}
  0x2f   :  { %44 = dma.vmem_to_hbm [thread:$0]  %s42_s19, 256, %s141_s1, [#allocation4]  }
  0x30   :  { %102 = dma.done.wait [#allocation4], 256  }
  0x31   :  { %103 = vsyncadd [#allocation4], 4294967040 }
  0x32   :  { %48 = vsyncpa [#allocation3], 1 }
  0x33   :  { %49 = vsyncpa [#allocation4], 1 }

</bundles_post_ra>
